<compile_context>
chip_gen: v6e
topology: v6e:2x2x1
jax: 0.10.0
libtpu: 0.0.40
codegen_flags: <defaults>
</compile_context>

<pallas_src>
import functools
import math

import jax
import jax.numpy as jnp
from jax.experimental import pallas as pl
from jax.experimental.pallas import tpu as pltpu
from jax.scipy.special import gammaln, logsumexp


# ---------------------------------------------------------------------------
# Fused kernel: sample the W^T tile (vMF per node) + MXU matmul + <mu, w>
# ---------------------------------------------------------------------------
def _fused_vmf_linear_kernel(x_ref, mu_t_ref, v_t_ref, w0_ref,
                             o_ref, dotp_ref, *, mxu_dtype):
    K, tn = mu_t_ref.shape

    mu_t = mu_t_ref[...]          # (K, tn)  unnormalized mu^T for this node tile
    v_t = v_t_ref[...]            # (K, tn)  tangent normals (row 0 is zero)
    w0 = w0_ref[...]              # (1, tn)  Wood w0 marginal samples

    # per-node (per-column) normalizations
    mu_n = mu_t * jax.lax.rsqrt(jnp.sum(mu_t * mu_t, axis=0, keepdims=True))
    v_n = v_t * jax.lax.rsqrt(jnp.sum(v_t * v_t, axis=0, keepdims=True))

    # e1 = one-hot along the feature (K) axis
    e1 = (jax.lax.broadcasted_iota(jnp.int32, (K, tn), 0) == 0).astype(jnp.float32)

    # Wood construction: s = [w0, sqrt(1 - w0^2) * v]
    s_t = w0 * e1 + jnp.sqrt(jnp.maximum(1.0 - w0 * w0, 0.0)) * v_n

    # Householder reflection mapping e1 -> mu_n (exactly as the torch reference)
    u = e1 - mu_n
    u = u * jax.lax.rsqrt(jnp.sum(u * u, axis=0, keepdims=True))
    w_t = s_t - 2.0 * jnp.sum(s_t * u, axis=0, keepdims=True) * u   # (K, tn) = W^T tile

    # per-node <mu, w>  (the kappa * dotp term of the vMF log-density)
    dotp_ref[...] = jnp.sum(mu_n * w_t, axis=0, keepdims=True)

    # F.linear without bias: canonical (tm, K) x (K, tn) MXU matmul, f32 accumulate
    o_ref[...] = jnp.dot(x_ref[...].astype(mxu_dtype), w_t.astype(mxu_dtype),
                         preferred_element_type=jnp.float32).astype(o_ref.dtype)


def _pick_tile(extent, pref=128):
    """Tile that satisfies the (8,128) block constraints: full extent or 128."""
    if extent <= pref:
        return extent
    return pref if extent % pref == 0 else extent


def vmf_linear_fused(x, mu_t, v_t, w0_row, *, mxu_dtype=jnp.float32):
    """x: (B, K) f32; mu_t, v_t: (K, O) f32; w0_row: (1, O) f32.
    Returns (out (B, O) f32, dotp (1, O) f32 with dotp[0, n] = <mu_n, w_n>)."""
    B, K = x.shape
    Kw, O = mu_t.shape
    assert Kw == K and v_t.shape == (K, O) and w0_row.shape == (1, O)

    tm = _pick_tile(B)            # batch tile (sublane dim)
    tn = _pick_tile(O)            # node tile  (lane dim -> lane-dense output)
    grid = (O // tn, B // tm)     # (parallel over node tiles, arbitrary over batch)
    # TODO(synk): for layers whose full K row does not fit VMEM, the per-node
    # norms need a two-pass (partial-sum then apply) grid; not needed here.

    cost = pl.CostEstimate(
        flops=2 * B * K * O + 14 * K * O,
        transcendentals=4 * K * O,
        bytes_accessed=4 * (B * K + 2 * K * O + O + B * O + O),
    )

    kernel = functools.partial(_fused_vmf_linear_kernel, mxu_dtype=mxu_dtype)
    out, dotp = pl.pallas_call(
        kernel,
        grid=grid,
        in_specs=[
            pl.BlockSpec((tm, K), lambda j, i: (i, 0)),      # x
            pl.BlockSpec((K, tn), lambda j, i: (0, j)),      # mu^T
            pl.BlockSpec((K, tn), lambda j, i: (0, j)),      # tangent normals
            pl.BlockSpec((1, tn), lambda j, i: (0, j)),      # w0
        ],
        out_specs=(
            pl.BlockSpec((tm, tn), lambda j, i: (i, j)),     # output (lane-dense)
            pl.BlockSpec((1, tn), lambda j, i: (0, j)),      # <mu, w>, resident over batch axis
        ),
        out_shape=(
            jax.ShapeDtypeStruct((B, O), jnp.float32),
            jax.ShapeDtypeStruct((1, O), jnp.float32),
        ),
        compiler_params=pltpu.CompilerParams(
            dimension_semantics=("parallel", "arbitrary")),
        cost_estimate=cost,
    )(x, mu_t, v_t, w0_row)
    return out, dotp


# ---------------------------------------------------------------------------
# Small scalar helpers kept in plain JAX (not worth a pallas_call)
# ---------------------------------------------------------------------------
def _sample_w0(key, kappa, d, n_nodes, n_prop=64):
    """Wood (1994) rejection sampler for the vMF w0 marginal, vectorized over
    nodes: draw `n_prop` proposals per node and keep the first accepted one."""
    dm1 = jnp.float32(d - 1)
    kappa = jnp.asarray(kappa, jnp.float32)
    kmr = jnp.sqrt(4.0 * kappa * kappa + dm1 * dm1)
    bb = (kmr - 2.0 * kappa) / dm1
    aa = (kmr + 2.0 * kappa + dm1) / 4.0
    dd = 4.0 * aa * bb / (1.0 + bb) - dm1 * jnp.log(dm1)

    k_eps, k_uns = jax.random.split(key)
    eps = jax.random.beta(k_eps, 0.5 * float(d - 1), 0.5 * float(d - 1),
                          (n_nodes, n_prop)).astype(jnp.float32)
    uns = jax.random.uniform(k_uns, (n_nodes, n_prop), jnp.float32)
    w0 = (1.0 - (1.0 + bb) * eps) / (1.0 - (1.0 - bb) * eps)
    t0 = 2.0 * aa * bb / (1.0 - (1.0 - bb) * eps)
    accept = (dm1 * jnp.log(t0) - t0 + dd - jnp.log(uns)) >= 0.0
    # TODO(synk): torch loops until acceptance; with n_prop proposals a total
    # miss is astronomically unlikely, otherwise proposal 0 is used as fallback.
    first = jnp.argmax(accept, axis=1)
    return jnp.take_along_axis(w0, first[:, None], axis=1)[:, 0]      # (n_nodes,)


def _log_bessel_i(nu, kappa, n_terms=64):
    # TODO(synk): replaces mpmath.besseli (vMFLogPartition) with a fixed-term
    # ascending power series for log I_nu(kappa); accurate for moderate kappa.
    m = jnp.arange(n_terms, dtype=jnp.float32)
    log_terms = ((2.0 * m + nu) * jnp.log(kappa / 2.0)
                 - gammaln(m + 1.0) - gammaln(m + nu + 1.0))
    return logsumexp(log_terms)


def _vmf_log_partition(d, kappa):
    s = 0.5 * d - 1.0
    return (d * (-0.5 * math.log(2.0 * math.pi)) + s * jnp.log(kappa)
            - _log_bessel_i(s, kappa))


# ---------------------------------------------------------------------------
# Module wrapper mirroring vMF_NodeWise_nobias.forward
# ---------------------------------------------------------------------------
class VMFNodeWiseNoBiasPallas:
    """JAX/Pallas port of vMF_NodeWise_nobias.

    bias_mu / bias_rho are accepted for constructor parity with the torch
    module but (exactly as in the reference) never used: the layer has no
    bias, and weight_rho is the single shared log-kappa."""

    def __init__(self, in_features, out_features, weight_mu, weight_rho,
                 bias_mu=None, bias_rho=None, reg=1e-6, mxu_dtype=jnp.float32):
        self.in_features = in_features
        self.out_features = out_features
        self.weight_mu = jnp.asarray(weight_mu, jnp.float32)       # (out, in)
        self.weight_rho = jnp.asarray(weight_rho, jnp.float32)     # () log-kappa
        self.reg = reg
        # mxu_dtype=jnp.bfloat16 is the recommended setting on v6e/v7x when the
        # accuracy budget allows; the self-check below runs the f32 path.
        self.mxu_dtype = mxu_dtype
        self.log_prior = 0.0
        self.log_variational_posterior = 0.0
        self.training = True

    def __call__(self, x, key, sample=True, calculate_log_probs=False):
        K, O = self.in_features, self.out_features
        kappa = jnp.exp(self.weight_rho) + self.reg
        mu_t = self.weight_mu.T      # layout plumbing: kernel consumes mu^T (K, O)

        if self.training or sample:
            k_w0, k_v = jax.random.split(key)
            w0 = _sample_w0(k_w0, kappa, K, O)                        # (O,)
            v_t = jax.random.normal(k_v, (K, O), jnp.float32)
            v_t = v_t.at[0, :].set(0.0)   # tangent lives in components 1..K-1
        else:
            # deterministic path: w0 = 1 makes the sample collapse to e1, whose
            # Householder image is exactly mu/||mu||  (== vMF.mu in torch)
            w0 = jnp.ones((O,), jnp.float32)
            v_t = jnp.zeros((K, O), jnp.float32).at[1:, :].set(1.0)

        out, dotp = vmf_linear_fused(x, mu_t, v_t, w0.reshape(1, O),
                                     mxu_dtype=self.mxu_dtype)

        if self.training or calculate_log_probs:
            log_c = _vmf_log_partition(float(K), kappa)
            self.log_prior = 0.0
            self.log_variational_posterior = kappa * jnp.sum(dotp) + O * log_c
        else:
            self.log_prior, self.log_variational_posterior = (0, 0)
        return out


# ---------------------------------------------------------------------------
# Pure-JAX reference (torch (O, K) layout) for the self-check
# ---------------------------------------------------------------------------
def _ref_forward(x, weight_mu, w0, v_t):
    mu_n = weight_mu / jnp.linalg.norm(weight_mu, axis=1, keepdims=True)   # (O, K)
    v = v_t.T                                                              # (O, K), col 0 == 0
    v_n = v / jnp.linalg.norm(v, axis=1, keepdims=True)
    O, K = mu_n.shape
    e1 = jnp.zeros((O, K), jnp.float32).at[:, 0].set(1.0)
    s = w0[:, None] * e1 + jnp.sqrt(1.0 - w0[:, None] ** 2) * v_n
    u = e1 - mu_n
    u = u / jnp.linalg.norm(u, axis=1, keepdims=True)
    w = s - 2.0 * jnp.sum(s * u, axis=1, keepdims=True) * u                # (O, K) sampled W
    out = jnp.dot(x, w.T, precision=jax.lax.Precision.HIGHEST)
    dotp = jnp.sum(mu_n * w, axis=1)                                       # (O,)
    return out, dotp


if __name__ == "__main__":
    B, IN, OUT = 8, 32, 16

    root = jax.random.PRNGKey(0)
    k_x, k_mu, k_fwd = jax.random.split(root, 3)

    x = jax.random.normal(k_x, (B, IN), jnp.float32)
    weight_mu = jax.random.normal(k_mu, (OUT, IN), jnp.float32)
    weight_rho = jnp.float32(2.0)                 # shared log-kappa (kappa ~ 7.4)
    bias_mu = jnp.zeros((OUT,), jnp.float32)      # unused (no-bias layer)
    bias_rho = jnp.zeros((OUT,), jnp.float32)     # unused (no-bias layer)

    layer = VMFNodeWiseNoBiasPallas(IN, OUT, weight_mu, weight_rho, bias_mu, bias_rho)
    out = layer(x, k_fwd, sample=True, calculate_log_probs=True)
    out = jax.block_until_ready(out)
    lvp = jax.block_until_ready(layer.log_variational_posterior)

    # ---- pure-JAX reference with identical random draws ----
    kappa = jnp.exp(weight_rho) + layer.reg
    k_w0, k_v = jax.random.split(k_fwd)
    w0 = _sample_w0(k_w0, kappa, IN, OUT)
    v_t = jax.random.normal(k_v, (IN, OUT), jnp.float32).at[0, :].set(0.0)
    out_ref, dotp_ref = _ref_forward(x, weight_mu, w0, v_t)
    lvp_ref = kappa * jnp.sum(dotp_ref) + OUT * _vmf_log_partition(float(IN), kappa)

    assert out.shape == (B, OUT)
    assert bool(jnp.all(jnp.isfinite(out))), "non-finite output"
    # tolerance leaves headroom for the MXU f32 pass decomposition
    assert jnp.allclose(out, out_ref, atol=2e-2, rtol=2e-3), "linear output mismatch"
    assert jnp.allclose(lvp, lvp_ref, atol=1e-2, rtol=1e-4), "log posterior mismatch"

    print("KERNEL_OK")
</pallas_src>

<mosaic_0001>
module attributes {stable_mosaic.version = 11 : i64} {
  func.func @_fused_vmf_linear_kernel(%arg0: i32, %arg1: i32, %arg2: memref<8x32xf32, #tpu.memory_space<vmem>>, %arg3: memref<32x16xf32, #tpu.memory_space<vmem>>, %arg4: memref<32x16xf32, #tpu.memory_space<vmem>>, %arg5: memref<1x16xf32, #tpu.memory_space<vmem>>, %arg6: memref<8x16xf32, #tpu.memory_space<vmem>>, %arg7: memref<1x16xf32, #tpu.memory_space<vmem>>) attributes {dimension_semantics = [#tpu.dimension_semantics<parallel>, #tpu.dimension_semantics<arbitrary>], iteration_bounds = array<i64: 1, 1>, scalar_prefetch = 0 : i64, scratch_operands = 0 : i64, tpu.core_type = #tpu.core_type<tc>, window_params = [{transform_indices = @transform_0, window_bounds = array<i64: 8, 32>}, {transform_indices = @transform_1, window_bounds = array<i64: 32, 16>}, {transform_indices = @transform_2, window_bounds = array<i64: 32, 16>}, {transform_indices = @transform_3, window_bounds = array<i64: 1, 16>}, {transform_indices = @transform_4, window_bounds = array<i64: 8, 16>}, {transform_indices = @transform_5, window_bounds = array<i64: 1, 16>}]} {
    %c0 = arith.constant 0 : index
    %c0_0 = arith.constant 0 : index
    %0 = vector.load %arg3[%c0, %c0_0] : memref<32x16xf32, #tpu.memory_space<vmem>>, vector<32x16xf32>
    %c0_1 = arith.constant 0 : index
    %c0_2 = arith.constant 0 : index
    %1 = vector.load %arg4[%c0_1, %c0_2] : memref<32x16xf32, #tpu.memory_space<vmem>>, vector<32x16xf32>
    %c0_3 = arith.constant 0 : index
    %c0_4 = arith.constant 0 : index
    %2 = vector.load %arg5[%c0_3, %c0_4] : memref<1x16xf32, #tpu.memory_space<vmem>>, vector<1x16xf32>
    %3 = arith.mulf %0, %0 : vector<32x16xf32>
    %cst = arith.constant dense<0.000000e+00> : vector<16xf32>
    %4 = vector.multi_reduction <add>, %3, %cst [0] : vector<32x16xf32> to vector<16xf32>
    %5 = vector.shape_cast %4 : vector<16xf32> to vector<1x16xf32>
    %6 = math.rsqrt %5 : vector<1x16xf32>
    %7 = vector.broadcast %6 : vector<1x16xf32> to vector<32x16xf32>
    %8 = arith.mulf %0, %7 : vector<32x16xf32>
    %9 = arith.mulf %1, %1 : vector<32x16xf32>
    %cst_5 = arith.constant dense<0.000000e+00> : vector<16xf32>
    %10 = vector.multi_reduction <add>, %9, %cst_5 [0] : vector<32x16xf32> to vector<16xf32>
    %11 = vector.shape_cast %10 : vector<16xf32> to vector<1x16xf32>
    %12 = math.rsqrt %11 : vector<1x16xf32>
    %13 = vector.broadcast %12 : vector<1x16xf32> to vector<32x16xf32>
    %14 = arith.mulf %1, %13 : vector<32x16xf32>
    %15 = tpu.iota {dimensions = array<i32: 0>} : vector<32x16xi32>
    %c0_i32 = arith.constant 0 : i32
    %16 = vector.broadcast %c0_i32 : i32 to vector<32x16xi32>
    %17 = arith.cmpi eq, %15, %16 : vector<32x16xi32>
    %18 = arith.extui %17 : vector<32x16xi1> to vector<32x16xi32>
    %19 = arith.sitofp %18 : vector<32x16xi32> to vector<32x16xf32>
    %20 = vector.broadcast %2 : vector<1x16xf32> to vector<32x16xf32>
    %21 = arith.mulf %20, %19 : vector<32x16xf32>
    %22 = arith.mulf %2, %2 : vector<1x16xf32>
    %cst_6 = arith.constant 1.000000e+00 : f32
    %23 = vector.broadcast %cst_6 : f32 to vector<1x16xf32>
    %24 = arith.subf %23, %22 : vector<1x16xf32>
    %cst_7 = arith.constant 0.000000e+00 : f32
    %25 = vector.broadcast %cst_7 : f32 to vector<1x16xf32>
    %26 = arith.maximumf %24, %25 : vector<1x16xf32>
    %27 = math.sqrt %26 : vector<1x16xf32>
    %28 = vector.broadcast %27 : vector<1x16xf32> to vector<32x16xf32>
    %29 = arith.mulf %28, %14 : vector<32x16xf32>
    %30 = arith.addf %21, %29 : vector<32x16xf32>
    %31 = arith.subf %19, %8 : vector<32x16xf32>
    %32 = arith.mulf %31, %31 : vector<32x16xf32>
    %cst_8 = arith.constant dense<0.000000e+00> : vector<16xf32>
    %33 = vector.multi_reduction <add>, %32, %cst_8 [0] : vector<32x16xf32> to vector<16xf32>
    %34 = vector.shape_cast %33 : vector<16xf32> to vector<1x16xf32>
    %35 = math.rsqrt %34 : vector<1x16xf32>
    %36 = vector.broadcast %35 : vector<1x16xf32> to vector<32x16xf32>
    %37 = arith.mulf %31, %36 : vector<32x16xf32>
    %38 = arith.mulf %30, %37 : vector<32x16xf32>
    %cst_9 = arith.constant dense<0.000000e+00> : vector<16xf32>
    %39 = vector.multi_reduction <add>, %38, %cst_9 [0] : vector<32x16xf32> to vector<16xf32>
    %40 = vector.shape_cast %39 : vector<16xf32> to vector<1x16xf32>
    %cst_10 = arith.constant 2.000000e+00 : f32
    %41 = vector.broadcast %cst_10 : f32 to vector<1x16xf32>
    %42 = arith.mulf %41, %40 : vector<1x16xf32>
    %43 = vector.broadcast %42 : vector<1x16xf32> to vector<32x16xf32>
    %44 = arith.mulf %43, %37 : vector<32x16xf32>
    %45 = arith.subf %30, %44 : vector<32x16xf32>
    %46 = arith.mulf %8, %45 : vector<32x16xf32>
    %cst_11 = arith.constant dense<0.000000e+00> : vector<16xf32>
    %47 = vector.multi_reduction <add>, %46, %cst_11 [0] : vector<32x16xf32> to vector<16xf32>
    %48 = vector.shape_cast %47 : vector<16xf32> to vector<1x16xf32>
    %c0_12 = arith.constant 0 : index
    %c0_13 = arith.constant 0 : index
    %49 = vector.load %arg7[%c0_12, %c0_13] : memref<1x16xf32, #tpu.memory_space<vmem>>, vector<1x16xf32>
    tpu.vector_store %arg7[%c0_12, %c0_13], %48 {strides = array<i32>} : memref<1x16xf32, #tpu.memory_space<vmem>>, vector<1x16xf32>,
    %c0_14 = arith.constant 0 : index
    %c0_15 = arith.constant 0 : index
    %50 = vector.load %arg2[%c0_14, %c0_15] : memref<8x32xf32, #tpu.memory_space<vmem>>, vector<8x32xf32>
    %cst_16 = arith.constant dense<0.000000e+00> : vector<8x16xf32>
    %51 = tpu.matmul %50, %45, %cst_16 {dimension_numbers = #tpu.dot_dimension_numbers<[1], [0], [0], [1], [0, 0, 1, 1], [], []>} : vector<8x32xf32>, vector<32x16xf32>, vector<8x16xf32> -> vector<8x16xf32>
    %c0_17 = arith.constant 0 : index
    %c0_18 = arith.constant 0 : index
    %52 = vector.load %arg6[%c0_17, %c0_18] : memref<8x16xf32, #tpu.memory_space<vmem>>, vector<8x16xf32>
    tpu.vector_store %arg6[%c0_17, %c0_18], %51 {strides = array<i32>} : memref<8x16xf32, #tpu.memory_space<vmem>>, vector<8x16xf32>,
    return
  }
  func.func @transform_0(%arg0: i32, %arg1: i32) -> (i32, i32) {
    %c0_i32 = arith.constant 0 : i32
    %c0_i32_0 = arith.constant 0 : i32
    return %arg1, %c0_i32 : i32, i32
  }
  func.func @transform_1(%arg0: i32, %arg1: i32) -> (i32, i32) {
    %c0_i32 = arith.constant 0 : i32
    %c0_i32_0 = arith.constant 0 : i32
    return %c0_i32, %arg0 : i32, i32
  }
  func.func @transform_2(%arg0: i32, %arg1: i32) -> (i32, i32) {
    %c0_i32 = arith.constant 0 : i32
    %c0_i32_0 = arith.constant 0 : i32
    return %c0_i32, %arg0 : i32, i32
  }
  func.func @transform_3(%arg0: i32, %arg1: i32) -> (i32, i32) {
    %c0_i32 = arith.constant 0 : i32
    %c0_i32_0 = arith.constant 0 : i32
    return %c0_i32, %arg0 : i32, i32
  }
  func.func @transform_4(%arg0: i32, %arg1: i32) -> (i32, i32) {
    %c0_i32 = arith.constant 0 : i32
    return %arg1, %arg0 : i32, i32
  }
  func.func @transform_5(%arg0: i32, %arg1: i32) -> (i32, i32) {
    %c0_i32 = arith.constant 0 : i32
    %c0_i32_0 = arith.constant 0 : i32
    return %c0_i32, %arg0 : i32, i32
  }
}

</mosaic_0001>

<bundles_post_ra>
// kernel: tpu_custom_call.1
= control target key start
LH: loop header
LB: loop body
LE: loop exit
PB: predicated region body
PF: predicated region fallthrough
CT: control target
= control target key end

     0   :  { %11 = vsyncpa [#allocation3], 0  ;;  %vm34_vm0 = vcmask 130048   ;;  %v375_v3 = vmov 0.0   ;;  %vm376_vm1 = vmmov 0   ;;  %s508_s0 = inlined_call_operand.vmem [shape: f32[8,32], index: 0, kind: input, shape index: {}]   ;;  %s509_s1 = inlined_call_operand.vmem [shape: f32[32,16], index: 1, kind: input, shape index: {}]   ;;  %s510_s2 = inlined_call_operand.vmem [shape: f32[32,16], index: 2, kind: input, shape index: {}]   ;;  %s511_s3 = inlined_call_operand.vmem [shape: f32[1,16], index: 3, kind: input, shape index: {}]   ;;  %s512_s4 = inlined_call_operand.hbm [shape: f32[8,16], index: 4, kind: output, shape index: {0}]   ;;  %s513_s5 = inlined_call_operand.hbm [shape: f32[1,16], index: 5, kind: output, shape index: {1}]  }
   0x1   :  { %v21_v0 = vld [vmem:[%s509_s1] sm:$0xff]  ;;  %v22_v1 = vld [vmem:[%s509_s1 + $0x8] sm:$0xff]  ;;  %v23_v2 = vld [vmem:[%s509_s1 + $0x10] sm:$0xff]  ;;  %308 = vmatprep.subr.mxu0 %v375_v3  ;;  %316 = vmatprep.mubr.msk.f32.mxu0 %vm376_vm1, %v375_v3 }
   0x2   :  { %v24_v4 = vld [vmem:[%s509_s1 + $0x18] sm:$0xff]  ;;  %v30_v5 = vmul.f32 %v21_v0, %v21_v0  ;;  %v31_v6 = vmul.f32 %v22_v1, %v22_v1  ;;  %v32_v7 = vmul.f32 %v23_v2, %v23_v2 }
   0x3   :  { %v33_v8 = vmul.f32 %v24_v4, %v24_v4 }
   0x4   :  { %v35_v9 = vsel %vm34_vm0, %v30_v5, 0.0  ;;  %v36_v10 = vsel %vm34_vm0, %v31_v6, 0.0  ;;  %v38_v11 = vsel %vm34_vm0, %v32_v7, 0.0 }
   0x5   :  { %12 = vsyncpa [#allocation5], 0  ;;  %v429_v12 = vld [vmem:[%s510_s2] sm:$0xff]  ;;  %v434_v13 = vld [vmem:[%s510_s2 + $0x8] sm:$0xff]  ;;  %v37_v14 = vadd.f32 %v36_v10, %v35_v9  ;;  %v40_v15 = vsel %vm34_vm0, %v33_v8, 0.0  ;;  %v75_v38 = vlaneseq  ;;  %vm198_vm5 = vcmask 261120  }
   0x6   :  { %v53_v17 = vmul.f32 %v429_v12, %v429_v12  ;;  %v54_v18 = vmul.f32 %v434_v13, %v434_v13  ;;  %v444_v19 = vld [vmem:[%s510_s2 + $0x10] sm:$0xff]  ;;  %v453_v25 = vld [vmem:[%s510_s2 + $0x18] sm:$0xff]  ;;  %v29_v37 = vld [vmem:[%s511_s3] sm:$0x1]  ;;  %vm195_vm6 = vcmask 122880  }
   0x7   :  { %v39_v16 = vadd.f32 %v38_v11, %v37_v14  ;;  %v55_v22 = vmul.f32 %v444_v19, %v444_v19  ;;  %v56_v29 = vmul.f32 %v453_v25, %v453_v25  ;;  %v102_v40 = vmul.f32 %v29_v37, %v29_v37 }
   0x8   :  { %v57_v23 = vsel %vm34_vm0, %v53_v17, 0.0  ;;  %v58_v24 = vsel %vm34_vm0, %v54_v18, 0.0  ;;  %v76_v41 = vshrl.u32 %v75_v38, 7 }
   0x9   :  { %v41_v20 = vadd.f32 %v40_v15, %v39_v16  ;;  %v59_v28 = vadd.f32 %v58_v24, %v57_v23  ;;  %v60_v30 = vsel %vm34_vm0, %v55_v22, 0.0  ;;  %v62_v34 = vsel %vm34_vm0, %v56_v29, 0.0 }
   0xa   :  { %v103_v43 = vsub.f32 1.0, %v102_v40  ;;  %vm80_vm2 = vcmp.eq.s32.totalorder %v76_v41, 0 }
   0xb   :  { %v42_v21 = vrot.slane %v41_v20, 4  ;;  %v61_v33 = vadd.f32 %v60_v30, %v59_v28  ;;  %v301_v47 = vsel %vm80_vm2, 1.0, %v375_v3 }
   0xc   :  { %v104_v45 = vmax.f32 %v103_v43, 0.0 }
   0xd   :  { %v43_v26 = vadd.f32 %v42_v21, %v41_v20  ;;  %v63_v36 = vadd.f32 %v62_v34, %v61_v33  ;;  %v95_v20 = vsub.s32 0, %v76_v41 }
   0xe   :  { %vm107_vm3 = vcmp.eq.f32.partialorder %v104_v45, inf  ;;  %v110_v15 = vand.u32 2147483648, %v104_v45  ;;  %vm109_vm4 = vcmp.eq.f32.partialorder %v104_v45, 0.0 }
   0xf   :  { %v44_v27 = vrot.slane %v43_v26, 2  ;;  %v64_v39 = vrot.slane %v63_v36, 4  ;;  %v96_v23 = vrot.slane %v29_v37, %v95_v20 }
  0x11   :  { %v45_v31 = vadd.f32 %v44_v27, %v43_v26  ;;  %v65_v42 = vadd.f32 %v64_v39, %v63_v36  ;;  %v98_v30 = vmul.f32 %v301_v47, %v96_v23 }
  0x13   :  { %v46_v32 = vrot.slane %v45_v31, 1  ;;  %v66_v44 = vrot.slane %v65_v42, 2 }
  0x15   :  { %v47_v35 = vadd.f32 %v46_v32, %v45_v31  ;;  %v67_v52 = vadd.f32 %v66_v44, %v65_v42  ;;  %v99_v31 = vmul.f32 0.0, %v96_v23 }
  0x17   :  { %323 = vrsqrt.f32 %v47_v35  ;;  %v68_v61 = vrot.slane %v67_v52, 1 }
  0x18   :  { %325 = vrsqrt.f32 %v104_v45 }
  0x24   :  { %v324_v46 = vpop.eup %323 }
  0x25   :  { %v463_v48 = vmul.f32 %v324_v46, %v21_v0  ;;  %v465_v49 = vmul.f32 %v324_v46, %v22_v1  ;;  %v467_v50 = vmul.f32 %v324_v46, %v23_v2  ;;  %v469_v51 = vmul.f32 %v324_v46, %v24_v4  ;;  %v326_v8 = vpop.eup %325 }
  0x26   :  { %v69_v4 = vadd.f32 %v68_v61, %v67_v52  ;;  %v106_v11 = vmul.f32 %v326_v8, %v104_v45  ;;  %v197_v8 = vld [vmem:[%s508_s0] sm:$0xff]  ;;  %s377_s0 = smov [#allocation4]  }
  0x27   :  { %v126_v53 = vsub.f32 %v301_v47, %v463_v48  ;;  %v127_v54 = vsub.f32 0.0, %v465_v49  ;;  %v128_v55 = vsub.f32 0.0, %v467_v50  ;;  %v129_v56 = vsub.f32 0.0, %v469_v51  ;;  %s289_s10 = sshll.u32 %s377_s0, 4  ;;  %s290_s10 = int_to_ptr.vmem [resolvable:$true] %s289_s10 }
  0x28   :  { %327 = vrsqrt.f32 %v69_v4  ;;  %v108_v17 = vsel %vm107_vm3, %v104_v45, %v106_v11  ;;  %s331_s11 = scalar_lea.vmem %s290_s10, 16  ;;  %s335_s12 = scalar_lea.vmem %s290_s10, 32 }
  0x29   :  { %v130_v57 = vmul.f32 %v126_v53, %v126_v53  ;;  %v131_v58 = vmul.f32 %v127_v54, %v127_v54  ;;  %v132_v59 = vmul.f32 %v128_v55, %v128_v55  ;;  %v133_v60 = vmul.f32 %v129_v56, %v129_v56  ;;  %p332_p0 = scmp.ne.s32.totalorder %s290_s10, %s331_s11  ;;  %p336_p1 = scmp.lt.s32.totalorder %s290_s10, %s290_s10 }
  0x2a   :  { %v111_v21 = vsel %vm109_vm4, %v110_v15, %v108_v17  ;;  %p337_p2 = scmp.lt.s32.totalorder %s335_s12, %s331_s11 }
  0x2b   :  { %v134_v62 = vsel %vm34_vm0, %v130_v57, 0.0  ;;  %v135_v63 = vsel %vm34_vm0, %v131_v58, 0.0  ;;  %v137_v0 = vsel %vm34_vm0, %v132_v59, 0.0  ;;  %v139_v2 = vsel %vm34_vm0, %v133_v60, 0.0 }
  0x2c   :  { %v136_v1 = vadd.f32 %v135_v63, %v134_v62  ;;  %v116_v24 = vrot.slane %v111_v21, %v95_v20  ;;  %p338_p3 = por %p337_p2, %p336_p1 }
  0x2e   :  { %v138_v5 = vadd.f32 %v137_v0, %v136_v1  ;;  %p339_p4 = pnand %p338_p3, %p332_p0 }
  0x30   :  { %v140_v6 = vadd.f32 %v139_v2, %v138_v5 }
  0x32   :  { %v141_v7 = vrot.slane %v140_v6, 4 }
  0x34   :  { %v142_v9 = vadd.f32 %v141_v7, %v140_v6 }
  0x35   :  { %v328_v22 = vpop.eup %327 }
  0x36   :  { %v143_v10 = vrot.slane %v142_v9, 2  ;;  %v71_v26 = vmul.f32 %v328_v22, %v429_v12  ;;  %v72_v27 = vmul.f32 %v328_v22, %v434_v13  ;;  %v73_v28 = vmul.f32 %v328_v22, %v444_v19 }
  0x37   :  { %v74_v29 = vmul.f32 %v328_v22, %v453_v25 }
  0x38   :  { %v144_v14 = vadd.f32 %v143_v10, %v142_v9  ;;  %v118_v32 = vmul.f32 %v116_v24, %v71_v26  ;;  %v119_v33 = vmul.f32 %v116_v24, %v72_v27  ;;  %v120_v34 = vmul.f32 %v116_v24, %v73_v28 }
  0x39   :  { %v121_v35 = vmul.f32 %v116_v24, %v74_v29 }
  0x3a   :  { %v145_v16 = vrot.slane %v144_v14, 1  ;;  %v122_v36 = vadd.f32 %v118_v32, %v98_v30  ;;  %v123_v38 = vadd.f32 %v119_v33, %v99_v31  ;;  %v124_v39 = vadd.f32 %v120_v34, %v99_v31 }
  0x3b   :  { %v125_v40 = vadd.f32 %v121_v35, %v99_v31 }
  0x3c   :  { %v146_v18 = vadd.f32 %v145_v16, %v144_v14 }
  0x3e   :  { %329 = vrsqrt.f32 %v146_v18 }
  0x4b   :  { %v330_v37 = vpop.eup %329 }
  0x4c   :  { %v148_v41 = vmul.f32 %v330_v37, %v126_v53  ;;  %v149_v42 = vmul.f32 %v330_v37, %v127_v54  ;;  %v150_v12 = vmul.f32 %v330_v37, %v128_v55  ;;  %v151_v43 = vmul.f32 %v330_v37, %v129_v56 }
  0x4e   :  { %v152_v13 = vmul.f32 %v148_v41, %v122_v36  ;;  %v153_v44 = vmul.f32 %v149_v42, %v123_v38  ;;  %v154_v19 = vmul.f32 %v150_v12, %v124_v39  ;;  %v155_v45 = vmul.f32 %v151_v43, %v125_v40 }
  0x50   :  { %v156_v25 = vsel %vm34_vm0, %v152_v13, 0.0  ;;  %v157_v46 = vsel %vm34_vm0, %v153_v44, 0.0  ;;  %v159_v47 = vsel %vm34_vm0, %v154_v19, 0.0  ;;  %v161_v57 = vsel %vm34_vm0, %v155_v45, 0.0 }
  0x51   :  { %v158_v52 = vadd.f32 %v157_v46, %v156_v25 }
  0x53   :  { %v160_v58 = vadd.f32 %v159_v47, %v158_v52 }
  0x55   :  { %v162_v59 = vadd.f32 %v161_v57, %v160_v58 }
  0x57   :  { %v163_v60 = vrot.slane %v162_v59, 4 }
  0x59   :  { %v164_v53 = vadd.f32 %v163_v60, %v162_v59 }
  0x5b   :  { %v165_v54 = vrot.slane %v164_v53, 2 }
  0x5d   :  { %v166_v55 = vadd.f32 %v165_v54, %v164_v53 }
  0x5f   :  { %v167_v56 = vrot.slane %v166_v55, 1 }
  0x61   :  { %v168_v61 = vadd.f32 %v167_v56, %v166_v55 }
  0x63   :  { %v169_v62 = vmul.f32 2.0, %v168_v61 }
  0x65   :  { %v173_v63 = vmul.f32 %v169_v62, %v151_v43  ;;  %v172_v0 = vmul.f32 %v169_v62, %v150_v12  ;;  %v171_v1 = vmul.f32 %v169_v62, %v149_v42  ;;  %v170_v5 = vmul.f32 %v169_v62, %v148_v41 }
  0x67   :  { %v177_v2 = vsub.f32 %v125_v40, %v173_v63  ;;  %v176_v4 = vsub.f32 %v124_v39, %v172_v0  ;;  %v175_v6 = vsub.f32 %v123_v38, %v171_v1  ;;  %v174_v7 = vsub.f32 %v122_v36, %v170_v5 }
  0x69   :  { %309 = vmatpush3.msra.mxu0 %v177_v2  ;;  %v179_v9 = vmul.f32 %v175_v6, %v465_v49  ;;  %v178_v10 = vmul.f32 %v174_v7, %v463_v48  ;;  %v180_v11 = vmul.f32 %v176_v4, %v467_v50  ;;  %v181_v17 = vmul.f32 %v177_v2, %v469_v51 }
  0x6a   :  { %310 = vmatprep.subr.mxu0 %v375_v3 }
  0x6b   :  { %311 = vmatpush3.msra.mxu0 %v176_v4  ;;  %v183_v14 = vsel %vm34_vm0, %v179_v9, 0.0  ;;  %v182_v15 = vsel %vm34_vm0, %v178_v10, 0.0  ;;  %v185_v18 = vsel %vm34_vm0, %v180_v11, 0.0 }
  0x6c   :  { %312 = vmatprep.subr.mxu0 %v375_v3  ;;  %v184_v16 = vadd.f32 %v183_v14, %v182_v15 }
  0x6d   :  { %313 = vmatpush3.msra.mxu0 %v175_v6 }
  0x6e   :  { %314 = vmatprep.subr.mxu0 %v375_v3  ;;  %v186_v20 = vadd.f32 %v185_v18, %v184_v16  ;;  %v187_v3 = vsel %vm34_vm0, %v181_v17, 0.0 }
  0x6f   :  { %315 = vmatpush3.msra.mxu0 %v174_v7 }
  0x70   :  { %317 = vmatmul.mubr.msk.f32.vlgmr.msra.gmra.mxu0 %vm198_vm5, %v197_v8  ;;  %v188_v21 = vadd.f32 %v187_v3, %v186_v20 }
  0x72   :  { %v189_v22 = vrot.slane %v188_v21, 4 }
  0x74   :  { %v190_v23 = vadd.f32 %v189_v22, %v188_v21 }
  0x76   :  { %v191_v49 = vrot.slane %v190_v23, 2 }
  0x78   :  { %v192_v24 = vadd.f32 %v191_v49, %v190_v23 }
  0x7a   :  { %v193_v48 = vrot.slane %v192_v24, 1 }
  0x7c   :  { %v194_v26 = vadd.f32 %v193_v48, %v192_v24 }
  0x7e   :  { %196 = vst.msk [vmem:[#allocation4] sm:$0x1] %vm195_vm6, %v194_v26 }
  0x7f   :  { %342 = shalt.err (!%p339_p4)
}
  0x80   :  { %292 = dma.vmem_to_hbm [thread:$0]  %s290_s10, 16, %s513_s5, [#allocation5]  }
  0x81   :  { %s378_s15 = smov [#allocation2]  }
  0x82   :  { %s279_s16 = sshll.u32 %s378_s15, 4  ;;  %s280_s16 = int_to_ptr.vmem [resolvable:$true] %s279_s16 }
  0x83   :  { %s351_s17 = scalar_lea.vmem %s280_s16, 128  ;;  %p356_p6 = scmp.lt.s32.totalorder %s280_s16, %s280_s16 }
  0x84   :  { %p352_p5 = scmp.ne.s32.totalorder %s280_s16, %s351_s17  ;;  %p357_p7 = scmp.lt.s32.totalorder %s351_s17, %s351_s17 }
  0x86   :  { %p358_p8 = por %p357_p7, %p356_p6 }
  0x88   :  { %p359_p9 = pnand %p358_p8, %p352_p5 }
 0x130   :  { %v268_v50 = vpop.f32.mrf.mxu0 }
 0x131   :  { %272 = vst.msk [vmem:[#allocation2] sm:$0xff] %vm34_vm0, %v268_v50 }
 0x132   :  { %v318_v51 = vpop.f32.mrf.mxu0 }
 0x133   :  { %362 = shalt.err (!%p359_p9)
}
 0x134   :  { %282 = dma.vmem_to_hbm [thread:$0]  %s280_s16, 128, %s512_s4, [#allocation3]  }
 0x135   :  { %371 = dma.done.wait [#allocation3], 128  }
 0x136   :  { %372 = vsyncadd [#allocation3], 4294967168 }
 0x137   :  { %373 = dma.done.wait [#allocation5], 16  }
 0x138   :  { %374 = vsyncadd [#allocation5], 4294967280 }
 0x139   :  { %299 = vsyncpa [#allocation3], 1 }
 0x13a   :  { %300 = vsyncpa [#allocation5], 1 }

</bundles_post_ra>
